<compile_context>
chip_gen: v7x
topology: tpu7x:2x2x1
jax: 0.10.0
libtpu: 0.0.40
codegen_flags: <defaults>
</compile_context>

<pallas_src>
import functools
import math

import jax
import jax.numpy as jnp
from jax.experimental import pallas as pl
from jax.experimental.pallas import tpu as pltpu


def _fused_mlp_kernel(*refs, n_linear, packed_out_dims, matmul_dtype):
    """One (packed) batch tile of the fused MLP.

    refs = (x_ref, w_0, ..., w_{n_linear-1}, b_packed_ref, o_ref).
    Hidden activations stay as jnp values; only the final layer's result is
    written to o_ref.
    """
    x_ref = refs[0]
    w_refs = refs[1:1 + n_linear]
    b_ref = refs[1 + n_linear]
    o_ref = refs[2 + n_linear]

    h = x_ref[...]
    for idx in range(n_linear):
        pdout = packed_out_dims[idx]
        w = w_refs[idx][...]                      # already matmul_dtype (wrapper cast)
        b = b_ref[idx:idx + 1, :pdout]            # (1, pdout) f32, static slice
        if h.dtype != matmul_dtype:
            h = h.astype(matmul_dtype)
        y = jnp.dot(h, w, preferred_element_type=jnp.float32)   # MXU, f32 accumulate
        y = y + b                                 # bias add in f32 (VPU)
        if idx < n_linear - 1:
            y = jnp.maximum(y, 0.0)               # ReLU on hidden layers
        # TODO(synk): training-mode Dropout (random mask + 1/(1-p) scaling) is
        # not implemented; eval-mode dropout is the identity.
        h = y
    o_ref[...] = h.astype(o_ref.dtype)


def _choose_pack(B, dims, max_lanes=128):
    """Largest batch lane-pack factor p such that p | B and p*max(dims) <= 128."""
    widest = max(dims)
    for p in (8, 4, 2):
        if B % p == 0 and p * widest <= max_lanes:
            return p
    return 1


def _choose_batch_tile(packed_B, *, step=8, target=1024, min_steps=4,
                       small_cutoff=256, max_scan=8192):
    """Pick a block size over packed batch rows that (a) divides packed_B so no
    padding copy of x is needed, (b) is a multiple of `step` unless it is the
    full array, (c) amortizes the ~0.35us/step grid overhead, and (d) gives
    >= min_steps grid steps at large B (v7x megacore + DMA/compute overlap)."""
    if packed_B <= small_cutoff:
        return packed_B                              # single full-array tile
    divs = [d for d in range(step, min(packed_B, max_scan), step)
            if packed_B % d == 0]
    good = [d for d in divs if d <= target and packed_B // d >= min_steps]
    if good:
        return max(good)
    ok = [d for d in divs if d <= target]
    if ok:
        return max(ok)
    if divs:
        return min(divs)
    return packed_B                                  # caller may pad as a last resort


def deep_neural_network2_forward(x, params, *, matmul_dtype=jnp.float32,
                                 batch_pack=None, tile_m=None):
    """x: (B, input_dim) f32.  params: list of (w, b), w: (din, dout), b: (dout,)."""
    matmul_dtype = jnp.dtype(matmul_dtype)
    B, Din = x.shape
    out_dtype = x.dtype
    n_linear = len(params)
    out_dims = tuple(int(w.shape[1]) for w, _ in params)
    Dout = out_dims[-1]
    all_dims = (Din,) + out_dims

    pack = batch_pack if batch_pack is not None else _choose_pack(B, all_dims)
    assert B % pack == 0
    packed_B = B // pack
    packed_out_dims = tuple(pack * d for d in out_dims)

    # kron(I_pack, W): block-diagonal weight so `pack` batch rows share one
    # lane-dense matmul.  pack == 1 degenerates to plain W.  Cast once here so
    # the grid-invariant weights are never re-cast inside the kernel.
    eye = jnp.eye(pack, dtype=jnp.float32)
    ws = []
    for w, _ in params:
        wp = w.astype(jnp.float32)
        if pack > 1:
            wp = jnp.kron(eye, wp)
        ws.append(wp.astype(matmul_dtype))

    # All biases tiled by `pack`, packed into one (n_linear, pack*max_dout)
    # f32 array -> a single DMA, one sublane per layer.
    max_pdout = max(packed_out_dims)
    b_packed = jnp.stack([
        jnp.pad(jnp.tile(b.astype(jnp.float32), pack),
                (0, max_pdout - pack * b.shape[0]))
        for _, b in params], axis=0)

    # Lane-pack the batch: (B, Din) -> (B/pack, pack*Din) (contiguous reshape).
    x_in = x.reshape(packed_B, pack * Din)
    if x_in.dtype != matmul_dtype:
        x_in = x_in.astype(matmul_dtype)             # halves x DMA bytes for bf16

    # Batch-tile selection (divisor-based: no jnp.pad copy in the common case).
    row_step = 16 if matmul_dtype == jnp.dtype(jnp.bfloat16) else 8
    bytes_per_row = pack * Din * matmul_dtype.itemsize
    max_tile = max(row_step,
                   ((4 * 1024 * 1024) // max(1, bytes_per_row)) // row_step * row_step)
    if tile_m is None:
        tile_m = _choose_batch_tile(packed_B, step=row_step,
                                    target=min(1024, max_tile),
                                    small_cutoff=min(256, max_tile))
        if packed_B % tile_m != 0 or tile_m > max_tile:
            tile_m = min(1024, max_tile)             # pathological B: fixed tile + pad
    rows = packed_B
    pad = (-rows) % tile_m
    if pad:
        x_in = jnp.pad(x_in, ((0, pad), (0, 0)))     # rare fallback only
        rows += pad
    grid = (rows // tile_m,)

    kernel = functools.partial(
        _fused_mlp_kernel,
        n_linear=n_linear,
        packed_out_dims=packed_out_dims,
        matmul_dtype=matmul_dtype,
    )

    w_specs = [pl.BlockSpec(w.shape, lambda i: (0, 0)) for w in ws]

    out = pl.pallas_call(
        kernel,
        out_shape=jax.ShapeDtypeStruct((rows, pack * Dout), out_dtype),
        grid_spec=pltpu.PrefetchScalarGridSpec(
            num_scalar_prefetch=0,
            grid=grid,
            in_specs=[pl.BlockSpec((tile_m, pack * Din), lambda i: (i, 0))]
                     + w_specs
                     + [pl.BlockSpec(b_packed.shape, lambda i: (0, 0))],
            out_specs=pl.BlockSpec((tile_m, pack * Dout), lambda i: (i, 0)),
        ),
        compiler_params=pltpu.CompilerParams(
            dimension_semantics=("parallel",),
        ),
    )(x_in, *ws, b_packed)

    # Drop pad rows (no-op normally) and unpack the lane-packed batch.
    return out[:packed_B].reshape(B, Dout)


def init_params(key, input_dim, output_dim, n_layers, n_units):
    """Deterministic xavier-uniform weights (PyTorch xavier_uniform_), zero biases."""
    dims = [input_dim] + [n_units] * n_layers + [output_dim]
    params = []
    for i in range(len(dims) - 1):
        fan_in, fan_out = dims[i], dims[i + 1]
        key, sub = jax.random.split(key)
        bound = math.sqrt(6.0 / (fan_in + fan_out))
        # PyTorch weight is (out, in); sample in that shape then transpose so
        # the kernel computes x @ W == x @ W_pt.T.
        w_pt = jax.random.uniform(
            sub, (fan_out, fan_in), dtype=jnp.float32, minval=-bound, maxval=bound
        )
        w = jnp.transpose(w_pt)                          # (in, out)
        b = jnp.zeros((fan_out,), dtype=jnp.float32)     # init.constant_(bias, 0)
        params.append((w, b))
    return params


if __name__ == "__main__":
    # Shapes consistent with the module's constructor:
    #   input_dim=32, n_units=32, n_layers=3, output_dim=8, batch=8
    batch, input_dim, n_units, n_layers, output_dim = 8, 32, 32, 3, 8

    key = jax.random.PRNGKey(0)
    key, xkey = jax.random.split(key)
    x = jax.random.normal(xkey, (batch, input_dim), dtype=jnp.float32)

    params = init_params(key, input_dim, output_dim, n_layers, n_units)

    out = deep_neural_network2_forward(x, params)
    out = jax.block_until_ready(out)

    # Pure-JAX reference of the eval-mode forward pass for correctness.
    ref = x
    for idx, (w, b) in enumerate(params):
        ref = ref @ w + b
        if idx < len(params) - 1:
            ref = jnp.maximum(ref, 0.0)

    assert out.shape == (batch, output_dim)
    assert out.dtype == jnp.float32
    assert jnp.allclose(out, ref, atol=1e-5, rtol=1e-5), float(
        jnp.max(jnp.abs(out - ref))
    )
    print("KERNEL_OK")
</pallas_src>

<mosaic_0001>
module attributes {stable_mosaic.version = 11 : i64} {
  func.func @_fused_mlp_kernel(%arg0: i32, %arg1: memref<2x128xf32, #tpu.memory_space<vmem>>, %arg2: memref<128x128xf32, #tpu.memory_space<vmem>>, %arg3: memref<128x128xf32, #tpu.memory_space<vmem>>, %arg4: memref<128x128xf32, #tpu.memory_space<vmem>>, %arg5: memref<128x32xf32, #tpu.memory_space<vmem>>, %arg6: memref<4x128xf32, #tpu.memory_space<vmem>>, %arg7: memref<2x32xf32, #tpu.memory_space<vmem>>) attributes {dimension_semantics = [#tpu.dimension_semantics<parallel>], iteration_bounds = array<i64: 1>, scalar_prefetch = 0 : i64, scratch_operands = 0 : i64, tpu.core_type = #tpu.core_type<tc>, window_params = [{transform_indices = @transform_0, window_bounds = array<i64: 2, 128>}, {pipeline_mode = #tpu.pipeline_mode<synchronous>, transform_indices = @transform_1, window_bounds = array<i64: 128, 128>}, {pipeline_mode = #tpu.pipeline_mode<synchronous>, transform_indices = @transform_2, window_bounds = array<i64: 128, 128>}, {pipeline_mode = #tpu.pipeline_mode<synchronous>, transform_indices = @transform_3, window_bounds = array<i64: 128, 128>}, {pipeline_mode = #tpu.pipeline_mode<synchronous>, transform_indices = @transform_4, window_bounds = array<i64: 128, 32>}, {pipeline_mode = #tpu.pipeline_mode<synchronous>, transform_indices = @transform_5, window_bounds = array<i64: 4, 128>}, {transform_indices = @transform_6, window_bounds = array<i64: 2, 32>}]} {
    %c0 = arith.constant 0 : index
    %c0_0 = arith.constant 0 : index
    %0 = vector.load %arg1[%c0, %c0_0] : memref<2x128xf32, #tpu.memory_space<vmem>>, vector<2x128xf32>
    %c0_1 = arith.constant 0 : index
    %c0_2 = arith.constant 0 : index
    %1 = vector.load %arg2[%c0_1, %c0_2] : memref<128x128xf32, #tpu.memory_space<vmem>>, vector<128x128xf32>
    %c0_3 = arith.constant 0 : index
    %c0_4 = arith.constant 0 : index
    %2 = vector.load %arg6[%c0_3, %c0_4] : memref<4x128xf32, #tpu.memory_space<vmem>>, vector<1x128xf32>
    %cst = arith.constant dense<0.000000e+00> : vector<2x128xf32>
    %3 = tpu.matmul %0, %1, %cst {dimension_numbers = #tpu.dot_dimension_numbers<[1], [0], [0], [1], [0, 0, 1, 1], [], []>} : vector<2x128xf32>, vector<128x128xf32>, vector<2x128xf32> -> vector<2x128xf32>
    %4 = vector.broadcast %2 : vector<1x128xf32> to vector<2x128xf32>
    %5 = arith.addf %3, %4 : vector<2x128xf32>
    %cst_5 = arith.constant 0.000000e+00 : f32
    %6 = vector.broadcast %cst_5 : f32 to vector<2x128xf32>
    %7 = arith.maximumf %5, %6 : vector<2x128xf32>
    %c0_6 = arith.constant 0 : index
    %c0_7 = arith.constant 0 : index
    %8 = vector.load %arg3[%c0_6, %c0_7] : memref<128x128xf32, #tpu.memory_space<vmem>>, vector<128x128xf32>
    %c1 = arith.constant 1 : index
    %c0_8 = arith.constant 0 : index
    %9 = vector.load %arg6[%c1, %c0_8] : memref<4x128xf32, #tpu.memory_space<vmem>>, vector<1x128xf32>
    %cst_9 = arith.constant dense<0.000000e+00> : vector<2x128xf32>
    %10 = tpu.matmul %7, %8, %cst_9 {dimension_numbers = #tpu.dot_dimension_numbers<[1], [0], [0], [1], [0, 0, 1, 1], [], []>} : vector<2x128xf32>, vector<128x128xf32>, vector<2x128xf32> -> vector<2x128xf32>
    %11 = vector.broadcast %9 : vector<1x128xf32> to vector<2x128xf32>
    %12 = arith.addf %10, %11 : vector<2x128xf32>
    %cst_10 = arith.constant 0.000000e+00 : f32
    %13 = vector.broadcast %cst_10 : f32 to vector<2x128xf32>
    %14 = arith.maximumf %12, %13 : vector<2x128xf32>
    %c0_11 = arith.constant 0 : index
    %c0_12 = arith.constant 0 : index
    %15 = vector.load %arg4[%c0_11, %c0_12] : memref<128x128xf32, #tpu.memory_space<vmem>>, vector<128x128xf32>
    %c2 = arith.constant 2 : index
    %c0_13 = arith.constant 0 : index
    %16 = vector.load %arg6[%c2, %c0_13] : memref<4x128xf32, #tpu.memory_space<vmem>>, vector<1x128xf32>
    %cst_14 = arith.constant dense<0.000000e+00> : vector<2x128xf32>
    %17 = tpu.matmul %14, %15, %cst_14 {dimension_numbers = #tpu.dot_dimension_numbers<[1], [0], [0], [1], [0, 0, 1, 1], [], []>} : vector<2x128xf32>, vector<128x128xf32>, vector<2x128xf32> -> vector<2x128xf32>
    %18 = vector.broadcast %16 : vector<1x128xf32> to vector<2x128xf32>
    %19 = arith.addf %17, %18 : vector<2x128xf32>
    %cst_15 = arith.constant 0.000000e+00 : f32
    %20 = vector.broadcast %cst_15 : f32 to vector<2x128xf32>
    %21 = arith.maximumf %19, %20 : vector<2x128xf32>
    %c0_16 = arith.constant 0 : index
    %c0_17 = arith.constant 0 : index
    %22 = vector.load %arg5[%c0_16, %c0_17] : memref<128x32xf32, #tpu.memory_space<vmem>>, vector<128x32xf32>
    %c3 = arith.constant 3 : index
    %c0_18 = arith.constant 0 : index
    %23 = vector.load %arg6[%c3, %c0_18] : memref<4x128xf32, #tpu.memory_space<vmem>>, vector<1x32xf32>
    %cst_19 = arith.constant dense<0.000000e+00> : vector<2x32xf32>
    %24 = tpu.matmul %21, %22, %cst_19 {dimension_numbers = #tpu.dot_dimension_numbers<[1], [0], [0], [1], [0, 0, 1, 1], [], []>} : vector<2x128xf32>, vector<128x32xf32>, vector<2x32xf32> -> vector<2x32xf32>
    %25 = vector.broadcast %23 : vector<1x32xf32> to vector<2x32xf32>
    %26 = arith.addf %24, %25 : vector<2x32xf32>
    %c0_20 = arith.constant 0 : index
    %c0_21 = arith.constant 0 : index
    %27 = vector.load %arg7[%c0_20, %c0_21] : memref<2x32xf32, #tpu.memory_space<vmem>>, vector<2x32xf32>
    tpu.vector_store %arg7[%c0_20, %c0_21], %26 {strides = array<i32>} : memref<2x32xf32, #tpu.memory_space<vmem>>, vector<2x32xf32>,
    return
  }
  func.func @transform_0(%arg0: i32) -> (i32, i32) {
    %c0_i32 = arith.constant 0 : i32
    %c0_i32_0 = arith.constant 0 : i32
    return %arg0, %c0_i32 : i32, i32
  }
  func.func @transform_1(%arg0: i32) -> (i32, i32) {
    %c0_i32 = arith.constant 0 : i32
    %c0_i32_0 = arith.constant 0 : i32
    %c0_i32_1 = arith.constant 0 : i32
    return %c0_i32, %c0_i32_0 : i32, i32
  }
  func.func @transform_2(%arg0: i32) -> (i32, i32) {
    %c0_i32 = arith.constant 0 : i32
    %c0_i32_0 = arith.constant 0 : i32
    %c0_i32_1 = arith.constant 0 : i32
    return %c0_i32, %c0_i32_0 : i32, i32
  }
  func.func @transform_3(%arg0: i32) -> (i32, i32) {
    %c0_i32 = arith.constant 0 : i32
    %c0_i32_0 = arith.constant 0 : i32
    %c0_i32_1 = arith.constant 0 : i32
    return %c0_i32, %c0_i32_0 : i32, i32
  }
  func.func @transform_4(%arg0: i32) -> (i32, i32) {
    %c0_i32 = arith.constant 0 : i32
    %c0_i32_0 = arith.constant 0 : i32
    %c0_i32_1 = arith.constant 0 : i32
    return %c0_i32, %c0_i32_0 : i32, i32
  }
  func.func @transform_5(%arg0: i32) -> (i32, i32) {
    %c0_i32 = arith.constant 0 : i32
    %c0_i32_0 = arith.constant 0 : i32
    %c0_i32_1 = arith.constant 0 : i32
    return %c0_i32, %c0_i32_0 : i32, i32
  }
  func.func @transform_6(%arg0: i32) -> (i32, i32) {
    %c0_i32 = arith.constant 0 : i32
    %c0_i32_0 = arith.constant 0 : i32
    return %arg0, %c0_i32 : i32, i32
  }
}

</mosaic_0001>

<bundles_post_ra>
// kernel: tpu_custom_call.1
= control target key start
LH: loop header
LB: loop body
LE: loop exit
PB: predicated region body
PF: predicated region fallthrough
CT: control target
= control target key end

     0   :  { %11 = vsyncpa [#allocation3], 0  ;;  %s1056_s0 = inlined_call_operand.vmem [shape: f32[2,128], index: 0, kind: input, shape index: {}]   ;;  %s1057_s1 = inlined_call_operand.vmem [shape: f32[128,128], index: 1, kind: input, shape index: {}]   ;;  %s1058_s2 = inlined_call_operand.hbm [shape: f32[128,128], index: 2, kind: input, shape index: {}]   ;;  %s1059_s3 = inlined_call_operand.hbm [shape: f32[128,128], index: 3, kind: input, shape index: {}]   ;;  %s1060_s4 = inlined_call_operand.vmem [shape: f32[128,32], index: 4, kind: input, shape index: {}]   ;;  %s1061_s5 = inlined_call_operand.vmem [shape: f32[4,128], index: 5, kind: input, shape index: {}]   ;;  %s1062_s6 = inlined_call_operand.hbm [shape: f32[2,32], index: 6, kind: output, shape index: {}]  }
   0x1   :  { %12 = vsyncpa [#allocation6], 0 }
   0x2   :  { %13 = vsyncpa [#allocation4], 0  ;;  %s826_s21 = smov [#allocation2]   ;;  %s754_s25 = scalar_lea.hbm %s1058_s2, 2048 }
   0x3   :  { %s23_s22 = sshll.u32 %s826_s21, 4  ;;  %p755_p0 = scmp.ne.s32.totalorder %s1058_s2, %s754_s25  ;;  %s24_s22 = int_to_ptr.vmem [resolvable:$true] %s23_s22 }
   0x4   :  { %p758_p1 = scmp.lt.u32.totalorder %s754_s25, %s1058_s2 }
   0x6   :  { %p760_p2 = pnand %p758_p1, %p755_p0 }
   0x8   :  { %763 = shalt.err (!%p760_p2)
}
   0x9   :  { %s764_s30 = scalar_lea.vmem %s24_s22, 2048  ;;  %p769_p4 = scmp.lt.s32.totalorder %s24_s22, %s24_s22 }
   0xa   :  { %p765_p3 = scmp.ne.s32.totalorder %s24_s22, %s764_s30  ;;  %p770_p5 = scmp.lt.s32.totalorder %s764_s30, %s764_s30 }
   0xc   :  { %p771_p6 = por %p770_p5, %p769_p4 }
   0xe   :  { %p772_p7 = pnand %p771_p6, %p765_p3 }
  0x10   :  { %775 = shalt.err (!%p772_p7)
}
  0x11   :  { %s827_s7 = smov 128   ;;  %s828_s8 = smov 8  }
  0x12   :  { %29 = dma.hbm_to_vmem [thread:$0]  %s1058_s2, 2048, %s24_s22, [#allocation3], %s827_s7, %s827_s7, %s828_s8  }
  0x13   :  { %s829_s11 = smov [#allocation5]   ;;  %s776_s15 = scalar_lea.hbm %s1059_s3, 2048 }
  0x14   :  { %s35_s12 = sshll.u32 %s829_s11, 4  ;;  %p777_p8 = scmp.ne.s32.totalorder %s1059_s3, %s776_s15  ;;  %s36_s12 = int_to_ptr.vmem [resolvable:$true] %s35_s12 }
  0x15   :  { %p780_p9 = scmp.lt.u32.totalorder %s776_s15, %s1059_s3 }
  0x17   :  { %p782_p10 = pnand %p780_p9, %p777_p8 }
  0x19   :  { %785 = shalt.err (!%p782_p10)
}
  0x1a   :  { %s786_s20 = scalar_lea.vmem %s36_s12, 2048  ;;  %p791_p12 = scmp.lt.s32.totalorder %s36_s12, %s36_s12 }
  0x1b   :  { %p787_p11 = scmp.ne.s32.totalorder %s36_s12, %s786_s20  ;;  %p792_p13 = scmp.lt.s32.totalorder %s786_s20, %s786_s20 }
  0x1d   :  { %p793_p0 = por %p792_p13, %p791_p12 }
  0x1f   :  { %p794_p1 = pnand %p793_p0, %p787_p11 }
  0x21   :  { %797 = shalt.err (!%p794_p1)
}
  0x22   :  { %41 = dma.hbm_to_vmem [thread:$0]  %s1059_s3, 2048, %s36_s12, [#allocation6], %s827_s7, %s827_s7, %s828_s8  }
  0x23   :  { %820 = dma.done.wait [#allocation3], 2048  }
  0x24   :  { %821 = vsyncadd [#allocation3], 4294965248 }
  0x25   :  { %822 = dma.done.wait [#allocation6], 2048  }
  0x26   :  { %823 = vsyncadd [#allocation6], 4294965248  ;;  %v830_v0 = vmov 0.0|0.0   ;;  %vm831_vm0 = vmmov 0   ;;  %v832_v1 = vmov 0.0   ;;  %v53_v2 = vld [vmem:[%s1057_s1] sm:$0xff] }
  0x27   :  { %650 = vmatprep.subr.bf16.mxu0 %v830_v0  ;;  %542 = vmatprep.mubr.msk.f32.mxu0 %vm831_vm0, %v832_v1  ;;  %v54_v3 = vld [vmem:[%s1057_s1 + $0x8] sm:$0xff]  ;;  %v55_v4 = vld [vmem:[%s1057_s1 + $0x10] sm:$0xff]  ;;  %v56_v6 = vld [vmem:[%s1057_s1 + $0x18] sm:$0xff]  ;;  %s833_s15 = smov [#allocation7]   ;;  %vm420_vm1 = vcmask 254976  }
  0x28   :  { %674 = vmatprep.subr.bf16.mxu1 %v830_v0  ;;  %577 = vmatprep.mubr.msk.f32.mxu1 %vm831_vm0, %v832_v1  ;;  %v651_v5 = vpack.c.bf16 %v54_v3, %v53_v2  ;;  %v654_v7 = vpack.c.bf16 %v56_v6, %v55_v4  ;;  %v57_v8 = vld [vmem:[%s1057_s1 + $0x20] sm:$0xff]  ;;  %v58_v9 = vld [vmem:[%s1057_s1 + $0x28] sm:$0xff]  ;;  %v147_v12 = vld [vmem:[#allocation2 + $0x10] sm:$0xff]  ;;  %s428_s16 = sshll.u32 %s833_s15, 4  ;;  %s429_s16 = int_to_ptr.vmem [resolvable:$true] %s428_s16 }
  0x29   :  { %v145_v10 = vld [vmem:[#allocation2] sm:$0xff]  ;;  %v146_v11 = vld [vmem:[#allocation2 + $0x8] sm:$0xff]  ;;  %v148_v13 = vld [vmem:[#allocation2 + $0x18] sm:$0xff]  ;;  %v657_v14 = vpack.c.bf16 %v58_v9, %v57_v8  ;;  %p803_p3 = scmp.lt.s32.totalorder %s429_s16, %s429_s16 }
  0x2a   :  { %652 = vmatpush3.bf16.msra.mxu0 %v651_v5  ;;  %v675_v15 = vpack.c.bf16 %v146_v11, %v145_v10  ;;  %v59_v16 = vld [vmem:[%s1057_s1 + $0x30] sm:$0xff]  ;;  %v60_v17 = vld [vmem:[%s1057_s1 + $0x38] sm:$0xff]  ;;  %v678_v18 = vpack.c.bf16 %v148_v13, %v147_v12  ;;  %v149_v19 = vld [vmem:[#allocation2 + $0x20] sm:$0xff] }
  0x2b   :  { %653 = vmatprep.subr.bf16.mxu0 %v830_v0  ;;  %v150_v20 = vld [vmem:[#allocation2 + $0x28] sm:$0xff]  ;;  %v660_v21 = vpack.c.bf16 %v60_v17, %v59_v16  ;;  %v61_v22 = vld [vmem:[%s1057_s1 + $0x40] sm:$0xff]  ;;  %v151_v25 = vld [vmem:[#allocation2 + $0x30] sm:$0xff] }
  0x2c   :  { %676 = vmatpush3.bf16.msra.mxu1 %v675_v15  ;;  %v62_v23 = vld [vmem:[%s1057_s1 + $0x48] sm:$0xff]  ;;  %v681_v24 = vpack.c.bf16 %v150_v20, %v149_v19  ;;  %v152_v26 = vld [vmem:[#allocation2 + $0x38] sm:$0xff]  ;;  %v63_v28 = vld [vmem:[%s1057_s1 + $0x50] sm:$0xff] }
  0x2d   :  { %677 = vmatprep.subr.bf16.mxu1 %v830_v0  ;;  %v663_v27 = vpack.c.bf16 %v62_v23, %v61_v22  ;;  %v64_v29 = vld [vmem:[%s1057_s1 + $0x58] sm:$0xff]  ;;  %v684_v30 = vpack.c.bf16 %v152_v26, %v151_v25  ;;  %v153_v31 = vld [vmem:[#allocation2 + $0x40] sm:$0xff]  ;;  %v154_v32 = vld [vmem:[#allocation2 + $0x48] sm:$0xff] }
  0x2e   :  { %655 = vmatpush3.bf16.msra.mxu0 %v654_v7  ;;  %v666_v33 = vpack.c.bf16 %v64_v29, %v63_v28  ;;  %v65_v34 = vld [vmem:[%s1057_s1 + $0x60] sm:$0xff]  ;;  %v66_v35 = vld [vmem:[%s1057_s1 + $0x68] sm:$0xff]  ;;  %v687_v36 = vpack.c.bf16 %v154_v32, %v153_v31  ;;  %v155_v37 = vld [vmem:[#allocation2 + $0x50] sm:$0xff] }
  0x2f   :  { %656 = vmatprep.subr.bf16.mxu0 %v830_v0  ;;  %v156_v38 = vld [vmem:[#allocation2 + $0x58] sm:$0xff]  ;;  %v669_v39 = vpack.c.bf16 %v66_v35, %v65_v34  ;;  %v67_v40 = vld [vmem:[%s1057_s1 + $0x70] sm:$0xff]  ;;  %v157_v43 = vld [vmem:[#allocation2 + $0x60] sm:$0xff] }
  0x30   :  { %679 = vmatpush3.bf16.msra.mxu1 %v678_v18  ;;  %v68_v41 = vld [vmem:[%s1057_s1 + $0x78] sm:$0xff]  ;;  %v690_v42 = vpack.c.bf16 %v156_v38, %v155_v37  ;;  %v158_v44 = vld [vmem:[#allocation2 + $0x68] sm:$0xff]  ;;  %v52_v47 = vld [vmem:[%s1056_s0] sm:$0x3] }
  0x31   :  { %680 = vmatprep.subr.bf16.mxu1 %v830_v0  ;;  %v672_v45 = vpack.c.bf16 %v68_v41, %v67_v40  ;;  %v693_v46 = vpack.c.bf16 %v158_v44, %v157_v43  ;;  %v159_v48 = vld [vmem:[#allocation2 + $0x70] sm:$0xff]  ;;  %v160_v49 = vld [vmem:[#allocation2 + $0x78] sm:$0xff]  ;;  %v237_v51 = vld [vmem:[#allocation5] sm:$0xff] }
  0x32   :  { %658 = vmatpush3.bf16.msra.mxu0 %v657_v14  ;;  %v696_v50 = vpack.c.bf16 %v160_v49, %v159_v48  ;;  %v238_v52 = vld [vmem:[#allocation5 + $0x8] sm:$0xff]  ;;  %v239_v53 = vld [vmem:[#allocation5 + $0x10] sm:$0xff]  ;;  %v240_v55 = vld [vmem:[#allocation5 + $0x18] sm:$0xff] }
  0x33   :  { %659 = vmatprep.subr.bf16.mxu0 %v830_v0  ;;  %v699_v54 = vpack.c.bf16 %v238_v52, %v237_v51  ;;  %v702_v56 = vpack.c.bf16 %v240_v55, %v239_v53  ;;  %v241_v57 = vld [vmem:[#allocation5 + $0x20] sm:$0xff]  ;;  %v242_v58 = vld [vmem:[#allocation5 + $0x28] sm:$0xff]  ;;  %v243_v60 = vld [vmem:[#allocation5 + $0x30] sm:$0xff] }
  0x34   :  { %682 = vmatpush3.bf16.msra.mxu1 %v681_v24  ;;  %v705_v59 = vpack.c.bf16 %v242_v58, %v241_v57  ;;  %v244_v61 = vld [vmem:[#allocation5 + $0x38] sm:$0xff]  ;;  %v245_v63 = vld [vmem:[#allocation5 + $0x40] sm:$0xff]  ;;  %v246_v2 = vld [vmem:[#allocation5 + $0x48] sm:$0xff] }
  0x35   :  { %683 = vmatprep.subr.bf16.mxu1 %v830_v0  ;;  %v708_v62 = vpack.c.bf16 %v244_v61, %v243_v60  ;;  %v711_v3 = vpack.c.bf16 %v246_v2, %v245_v63  ;;  %v247_v4 = vld [vmem:[#allocation5 + $0x50] sm:$0xff]  ;;  %v248_v5 = vld [vmem:[#allocation5 + $0x58] sm:$0xff]  ;;  %v249_v7 = vld [vmem:[#allocation5 + $0x60] sm:$0xff] }
  0x36   :  { %661 = vmatpush3.bf16.msra.mxu0 %v660_v21  ;;  %v714_v6 = vpack.c.bf16 %v248_v5, %v247_v4  ;;  %v250_v8 = vld [vmem:[#allocation5 + $0x68] sm:$0xff]  ;;  %v438_v10 = vld [vmem:[%s1061_s5] ss:$0 sm:$0xff]  ;;  %v251_v15 = vld [vmem:[#allocation5 + $0x70] sm:$0xff] }
  0x37   :  { %662 = vmatprep.subr.bf16.mxu0 %v830_v0  ;;  %v717_v9 = vpack.c.bf16 %v250_v8, %v249_v7  ;;  %v252_v16 = vld [vmem:[#allocation5 + $0x78] sm:$0xff]  ;;  %v329_v18 = vld [vmem:[%s1060_s4] sm:$0xff]  ;;  %v330_v19 = vld [vmem:[%s1060_s4 + $0x8] sm:$0xff] }
  0x38   :  { %685 = vmatpush3.bf16.msra.mxu1 %v684_v30  ;;  %v720_v17 = vpack.c.bf16 %v252_v16, %v251_v15  ;;  %v331_v20 = vld [vmem:[%s1060_s4 + $0x10] sm:$0xff]  ;;  %v723_v21 = vpack.c.bf16 %v330_v19, %v329_v18  ;;  %v333_v23 = vld [vmem:[%s1060_s4 + $0x20] sm:$0xff]  ;;  %v334_v24 = vld [vmem:[%s1060_s4 + $0x28] sm:$0xff] }
  0x39   :  { %686 = vmatprep.subr.bf16.mxu1 %v830_v0  ;;  %v729_v25 = vpack.c.bf16 %v334_v24, %v333_v23  ;;  %v335_v26 = vld [vmem:[%s1060_s4 + $0x30] sm:$0xff]  ;;  %v337_v29 = vld [vmem:[%s1060_s4 + $0x40] sm:$0xff]  ;;  %v338_v30 = vld [vmem:[%s1060_s4 + $0x48] sm:$0xff] }
  0x3a   :  { %664 = vmatpush3.bf16.msra.mxu0 %v663_v27  ;;  %v336_v27 = vld [vmem:[%s1060_s4 + $0x38] sm:$0xff]  ;;  %v735_v31 = vpack.c.bf16 %v338_v30, %v337_v29  ;;  %v339_v32 = vld [vmem:[%s1060_s4 + $0x50] sm:$0xff]  ;;  %v341_v35 = vld [vmem:[%s1060_s4 + $0x60] sm:$0xff] }
  0x3b   :  { %665 = vmatprep.subr.bf16.mxu0 %v830_v0  ;;  %v732_v28 = vpack.c.bf16 %v336_v27, %v335_v26  ;;  %v439_v38 = vld [vmem:[%s1061_s5 + $0x1] ss:$0 sm:$0xff]  ;;  %v343_v43 = vld [vmem:[%s1060_s4 + $0x70] sm:$0xff]  ;;  %v344_v44 = vld [vmem:[%s1060_s4 + $0x78] sm:$0xff] }
  0x3c   :  { %688 = vmatpush3.bf16.msra.mxu1 %v687_v36  ;;  %v342_v36 = vld [vmem:[%s1060_s4 + $0x68] sm:$0xff] }
  0x3d   :  { %689 = vmatprep.subr.bf16.mxu1 %v830_v0  ;;  %v741_v37 = vpack.c.bf16 %v342_v36, %v341_v35 }
  0x3e   :  { %667 = vmatpush3.bf16.msra.mxu0 %v666_v33  ;;  %v340_v33 = vld [vmem:[%s1060_s4 + $0x58] sm:$0xff] }
  0x3f   :  { %668 = vmatprep.subr.bf16.mxu0 %v830_v0  ;;  %v738_v34 = vpack.c.bf16 %v340_v33, %v339_v32 }
  0x40   :  { %691 = vmatpush3.bf16.msra.mxu1 %v690_v42 }
  0x41   :  { %692 = vmatprep.subr.bf16.mxu1 %v830_v0 }
  0x42   :  { %670 = vmatpush3.bf16.msra.mxu0 %v669_v39 }
  0x43   :  { %671 = vmatprep.subr.bf16.mxu0 %v830_v0 }
  0x44   :  { %694 = vmatpush3.bf16.msra.mxu1 %v693_v46 }
  0x45   :  { %695 = vmatprep.subr.bf16.mxu1 %v830_v0 }
  0x46   :  { %673 = vmatpush3.bf16.msra.mxu0 %v672_v45  ;;  %v744_v45 = vpack.c.bf16 %v344_v44, %v343_v43 }
  0x47   :  { %698 = vmatprep.subr.bf16.mxu0 %v830_v0 }
  0x48   :  { %697 = vmatpush3.bf16.msra.mxu1 %v696_v50  ;;  %v441_v50 = vld [vmem:[%s1061_s5 + $0x3] ss:$0 sm:$0xff] }
  0x49   :  { %543 = vmatmul.mubr.f32.vlgmr.msra.gmra.mrb[0].mxu0 %v52_v47  ;;  %722 = vmatprep.subr.bf16.mxu1 %v830_v0 }
  0x4a   :  { %612 = vmatprep.mubr.msk.f32.mxu0 %vm831_vm0, %v832_v1  ;;  %700 = vmatpush3.bf16.msra.mxu0 %v699_v54 }
  0x4b   :  { %701 = vmatprep.subr.bf16.mxu0 %v830_v0 }
  0x4e   :  { %703 = vmatpush3.bf16.msra.mxu0 %v702_v56 }
  0x4f   :  { %704 = vmatprep.subr.bf16.mxu0 %v830_v0 }
  0x52   :  { %706 = vmatpush3.bf16.msra.mxu0 %v705_v59 }
  0x53   :  { %707 = vmatprep.subr.bf16.mxu0 %v830_v0 }
  0x56   :  { %709 = vmatpush3.bf16.msra.mxu0 %v708_v62 }
  0x57   :  { %710 = vmatprep.subr.bf16.mxu0 %v830_v0 }
  0x5a   :  { %712 = vmatpush3.bf16.msra.mxu0 %v711_v3 }
  0x5b   :  { %713 = vmatprep.subr.bf16.mxu0 %v830_v0 }
  0x5e   :  { %715 = vmatpush3.bf16.msra.mxu0 %v714_v6 }
  0x5f   :  { %716 = vmatprep.subr.bf16.mxu0 %v830_v0 }
  0x62   :  { %718 = vmatpush3.bf16.msra.mxu0 %v717_v9 }
  0x63   :  { %719 = vmatprep.subr.bf16.mxu0 %v830_v0 }
  0x66   :  { %721 = vmatpush3.bf16.msra.mxu0 %v720_v17 }
 0x11c   :  { %v140_v11 = vpop.f32.mrb[0].mxu0 }
 0x11d   :  { %v141_v12 = vadd.f32 %v438_v10, %v140_v11  ;;  %v544_v13 = vpop.f32.mrb[1].mxu0 }
 0x11f   :  { %v144_v14 = vmax.f32 %v141_v12, 0.0 }
 0x121   :  { %578 = vmatmul.mubr.f32.vlgmr.msra.gmra.mrb[0].mxu1 %v144_v14 }
 0x122   :  { %647 = vmatprep.mubr.msk.f32.mxu1 %vm831_vm0, %v832_v1  ;;  %v332_v1 = vld [vmem:[%s1060_s4 + $0x18] sm:$0xff]  ;;  %724 = vmatpush3.bf16.msra.mxu1 %v723_v21  ;;  %s798_s4 = scalar_lea.vmem %s429_s16, 32 }
 0x123   :  { %v726_v22 = vpack.c.bf16 %v332_v1, %v331_v20  ;;  %725 = vmatprep.subr.bf16.mxu1 %v830_v0  ;;  %p799_p2 = scmp.ne.s32.totalorder %s429_s16, %s798_s4  ;;  %p804_p4 = scmp.lt.s32.totalorder %s798_s4, %s798_s4 }
 0x125   :  { %p805_p5 = por %p804_p4, %p803_p3 }
 0x126   :  { %727 = vmatpush3.bf16.msra.mxu1 %v726_v22 }
 0x127   :  { %728 = vmatprep.subr.bf16.mxu1 %v830_v0  ;;  %p806_p6 = pnand %p805_p5, %p799_p2 }
 0x12a   :  { %730 = vmatpush3.bf16.msra.mxu1 %v729_v25 }
 0x12b   :  { %731 = vmatprep.subr.bf16.mxu1 %v830_v0 }
 0x12e   :  { %733 = vmatpush3.bf16.msra.mxu1 %v732_v28 }
 0x12f   :  { %734 = vmatprep.subr.bf16.mxu1 %v830_v0 }
 0x132   :  { %736 = vmatpush3.bf16.msra.mxu1 %v735_v31 }
 0x133   :  { %737 = vmatprep.subr.bf16.mxu1 %v830_v0 }
 0x136   :  { %739 = vmatpush3.bf16.msra.mxu1 %v738_v34 }
 0x137   :  { %740 = vmatprep.subr.bf16.mxu1 %v830_v0 }
 0x13a   :  { %742 = vmatpush3.bf16.msra.mxu1 %v741_v37 }
 0x13b   :  { %743 = vmatprep.subr.bf16.mxu1 %v830_v0  ;;  %v440_v0 = vld [vmem:[%s1061_s5 + $0x2] ss:$0 sm:$0xff] }
 0x13e   :  { %745 = vmatpush3.bf16.msra.mxu1 %v744_v45 }
 0x1f4   :  { %v232_v39 = vpop.f32.mrb[0].mxu1 }
 0x1f5   :  { %v233_v40 = vadd.f32 %v439_v38, %v232_v39  ;;  %v579_v41 = vpop.f32.mrb[1].mxu1 }
 0x1f7   :  { %v236_v42 = vmax.f32 %v233_v40, 0.0 }
 0x1f9   :  { %613 = vmatmul.mubr.f32.vlgmr.msra.gmra.mrb[2].mxu0 %v236_v42 }
 0x2cc   :  { %v324_v46 = vpop.f32.mrb[2].mxu0 }
 0x2cd   :  { %v325_v47 = vadd.f32 %v440_v0, %v324_v46  ;;  %v614_v48 = vpop.f32.mrb[3].mxu0 }
 0x2cf   :  { %v328_v49 = vmax.f32 %v325_v47, 0.0 }
 0x2d1   :  { %648 = vmatmul.mubr.f32.vlgmr.msra.gmra.mrb[2].mxu1 %v328_v49 }
 0x3a4   :  { %v416_v51 = vpop.f32.mrb[2].mxu1 }
 0x3a5   :  { %v417_v52 = vadd.f32 %v441_v50, %v416_v51  ;;  %v649_v53 = vpop.f32.mrb[3].mxu1 }
 0x3a7   :  { %421 = vst.msk [vmem:[#allocation7] sm:$0x3] %vm420_vm1, %v417_v52 }
 0x3a8   :  { %809 = shalt.err (!%p806_p6)
}
 0x3a9   :  { %s810_s19 = scalar_lea.hbm %s1062_s6, 32 }
 0x3aa   :  { %p811_p7 = scmp.ne.s32.totalorder %s1062_s6, %s810_s19  ;;  %p814_p8 = scmp.lt.u32.totalorder %s810_s19, %s1062_s6 }
 0x3ac   :  { %p816_p9 = pnand %p814_p8, %p811_p7 }
 0x3ae   :  { %819 = shalt.err (!%p816_p9)
}
 0x3af   :  { %431 = dma.vmem_to_hbm [thread:$0]  %s429_s16, 32, %s1062_s6, [#allocation4]  }
 0x3b0   :  { %824 = dma.done.wait [#allocation4], 32  }
 0x3b1   :  { %825 = vsyncadd [#allocation4], 4294967264 }
 0x3b2   :  { %435 = vsyncpa [#allocation3], 1 }
 0x3b3   :  { %436 = vsyncpa [#allocation6], 1 }
 0x3b4   :  { %437 = vsyncpa [#allocation4], 1 }

</bundles_post_ra>
